<compile_context>
chip_gen: v6e
topology: v6e:2x2x1
jax: 0.10.0
libtpu: 0.0.40
codegen_flags: <defaults>
</compile_context>

<pallas_src>
import jax
import jax.numpy as jnp
from jax.experimental import pallas as pl
from jax.experimental.pallas import tpu as pltpu

_LANE = 128
_TINY = 1024                              # below this many elements, just use XLA
_MAX_FULL_L_BLOCK_BYTES = 2 * 1024 * 1024  # cap for the "full ragged last dim" block


def _pick_tile_bytes():
    # v5-class chips have a 16 MiB default scoped-VMEM limit -> stay at ~2 MiB tiles
    # (2 MiB x 2 arrays x 2 buffers = 8 MiB). v6e/v7x get ~4 MiB tiles.
    try:
        kind = jax.devices()[0].device_kind.lower()
    except Exception:  # pragma: no cover - defensive; default is always safe
        kind = ""
    if "v5" in kind:
        return 2 * 1024 * 1024
    return 4 * 1024 * 1024


_TILE_BYTES = _pick_tile_bytes()


def _invert_kernel(x_ref, o_ref):
    # Pure VPU elementwise negation over the whole VMEM tile.
    o_ref[...] = -x_ref[...]


def _round_up(a, m):
    return -(-a // m) * m


def _sublane_pack(itemsize):
    # Sublanes per vreg for the dtype: 8 (f32), 16 (bf16/f16), 32 (int8/fp8).
    return max(8, 8 * (4 // max(1, itemsize)))


def _pick_block_rows(rows, cols, itemsize):
    """Rows per block: ~_TILE_BYTES sized, pack-aligned, and >=2 grid steps when possible."""
    pack = _sublane_pack(itemsize)
    if rows <= pack:
        return rows  # full-dim block (legal for any size)
    target = max(pack, (_TILE_BYTES // max(1, cols * itemsize)) // pack * pack)
    block_rows = target
    if block_rows >= rows:
        # Whole array would be one block: split so both v7x TensorCores get work.
        block_rows = _round_up(-(-rows // 2), pack)
    return block_rows


def _negate_2d(x2d, block_rows):
    rows, cols = x2d.shape
    grid = (pl.cdiv(rows, block_rows),)
    return pl.pallas_call(
        _invert_kernel,
        out_shape=jax.ShapeDtypeStruct((rows, cols), x2d.dtype),
        grid=grid,
        in_specs=[pl.BlockSpec((block_rows, cols), lambda i: (i, 0))],
        out_specs=pl.BlockSpec((block_rows, cols), lambda i: (i, 0)),
        compiler_params=pltpu.CompilerParams(dimension_semantics=("parallel",)),
    )(x2d)


@jax.jit
def invert(x):
    """torch.neg(x): elementwise negation, any shape/dtype (bool unsupported, as in torch)."""
    if x.dtype == jnp.bool_:
        raise TypeError("Invert (torch.neg) is not defined for bool tensors")
    n = x.size
    if n == 0:
        return x
    if n < _TINY:
        # Launch + plumbing overhead dwarfs the copy; XLA emits a fused negation.
        return jnp.negative(x)

    itemsize = jnp.dtype(x.dtype).itemsize

    if n % _LANE == 0:
        # Lane-dense flat view: widest 128-multiple that divides n -> fully packed
        # vregs, unmasked stores, no padding, no trailing slice.
        cols = _LANE
        for c in (1024, 512, 256):
            if n % c == 0:
                cols = c
                break
        rows = n // cols
        x2d = x.reshape(rows, cols)
        block_rows = _pick_block_rows(rows, cols, itemsize)
        return _negate_2d(x2d, block_rows).reshape(x.shape)

    # Ragged (n % 128 != 0): keep the natural (prod(leading), L) view and let the
    # trailing lanes be masked -- far cheaper than jnp.pad + slice (each a full HBM copy).
    if x.ndim >= 2:
        cols = x.shape[-1]
        rows = n // cols
    else:
        cols = n
        rows = 1
    pack = _sublane_pack(itemsize)
    if cols * pack * itemsize <= _MAX_FULL_L_BLOCK_BYTES:
        x2d = x.reshape(rows, cols)
        block_rows = _pick_block_rows(rows, cols, itemsize)
        return _negate_2d(x2d, block_rows).reshape(x.shape)

    # Last resort: enormous non-128-aligned last dim -> pad/slice path.
    cols = 1024
    rows = -(-n // cols)
    flat = jnp.pad(x.reshape(-1), (0, rows * cols - n))
    block_rows = _pick_block_rows(rows, cols, itemsize)
    out = _negate_2d(flat.reshape(rows, cols), block_rows)
    return out.reshape(-1)[:n].reshape(x.shape)


if __name__ == "__main__":
    key = jax.random.PRNGKey(0)

    # ECG-like input (batch=2, channels=4, length=512): lane-dense kernel path.
    x = jax.random.normal(key, (2, 4, 512), dtype=jnp.float32)
    y = invert(x)
    jax.block_until_ready(y)
    assert y.shape == x.shape and y.dtype == x.dtype
    assert jnp.allclose(y, -x)

    # Larger input: multi-block grid (>=2 steps) on the lane-dense path.
    xl = jax.random.normal(jax.random.PRNGKey(1), (8, 8, 4096), dtype=jnp.float32)
    yl = invert(xl)
    jax.block_until_ready(yl)
    assert jnp.allclose(yl, -xl)

    # Non-128-aligned length: ragged full-last-dim block path (no pad, masked lanes).
    x2 = jax.random.normal(jax.random.PRNGKey(2), (2, 4, 200), dtype=jnp.float32)
    y2 = invert(x2)
    jax.block_until_ready(y2)
    assert y2.shape == x2.shape and jnp.allclose(y2, -x2)

    # Tiny input: XLA bypass path.
    x3 = jax.random.normal(jax.random.PRNGKey(3), (3, 5), dtype=jnp.float32)
    y3 = invert(x3)
    jax.block_until_ready(y3)
    assert jnp.allclose(y3, -x3)

    print("KERNEL_OK")
</pallas_src>

<mosaic_0001>
module attributes {stable_mosaic.version = 11 : i64} {
  func.func @_invert_kernel(%arg0: i32, %arg1: memref<4x1024xf32, #tpu.memory_space<vmem>>, %arg2: memref<4x1024xf32, #tpu.memory_space<vmem>>) attributes {dimension_semantics = [#tpu.dimension_semantics<parallel>], iteration_bounds = array<i64: 1>, scalar_prefetch = 0 : i64, scratch_operands = 0 : i64, tpu.core_type = #tpu.core_type<tc>, window_params = [{transform_indices = @transform_0, window_bounds = array<i64: 4, 1024>}, {transform_indices = @transform_1, window_bounds = array<i64: 4, 1024>}]} {
    %c0 = arith.constant 0 : index
    %c0_0 = arith.constant 0 : index
    %0 = vector.load %arg1[%c0, %c0_0] : memref<4x1024xf32, #tpu.memory_space<vmem>>, vector<4x1024xf32>
    %cst = arith.constant 0.000000e+00 : f32
    %1 = vector.broadcast %cst : f32 to vector<4x1024xf32>
    %2 = arith.subf %1, %0 : vector<4x1024xf32>
    %c0_1 = arith.constant 0 : index
    %c0_2 = arith.constant 0 : index
    %3 = vector.load %arg2[%c0_1, %c0_2] : memref<4x1024xf32, #tpu.memory_space<vmem>>, vector<4x1024xf32>
    tpu.vector_store %arg2[%c0_1, %c0_2], %2 {strides = array<i32>} : memref<4x1024xf32, #tpu.memory_space<vmem>>, vector<4x1024xf32>,
    return
  }
  func.func @transform_0(%arg0: i32) -> (i32, i32) {
    %c0_i32 = arith.constant 0 : i32
    %c0_i32_0 = arith.constant 0 : i32
    return %arg0, %c0_i32 : i32, i32
  }
  func.func @transform_1(%arg0: i32) -> (i32, i32) {
    %c0_i32 = arith.constant 0 : i32
    %c0_i32_0 = arith.constant 0 : i32
    return %arg0, %c0_i32 : i32, i32
  }
}

</mosaic_0001>

<bundles_post_ra>
// kernel: invert.1
= control target key start
LH: loop header
LB: loop body
LE: loop exit
PB: predicated region body
PF: predicated region fallthrough
CT: control target
= control target key end

     0   :  { %s58_s0 = inlined_call_operand.vmem [shape: f32[4,1024], index: 0, kind: input, shape index: {}]   ;;  %s59_s1 = inlined_call_operand.vmem [shape: f32[4,1024], index: 1, kind: output, shape index: {}]  }
   0x1   :  { %v8_v0 = vld [vmem:[%s58_s0] sm:$0xff]  ;;  %v9_v1 = vld [vmem:[%s58_s0 + $0x8] sm:$0xff]  ;;  %v10_v2 = vld [vmem:[%s58_s0 + $0x10] sm:$0xff] }
   0x2   :  { %v12_v3 = vsub.f32 0.0, %v8_v0  ;;  %v13_v4 = vsub.f32 0.0, %v9_v1  ;;  %v14_v5 = vsub.f32 0.0, %v10_v2  ;;  %v11_v6 = vld [vmem:[%s58_s0 + $0x18] sm:$0xff] }
   0x3   :  { %v15_v7 = vsub.f32 0.0, %v11_v6 }
   0x4   :  { %16 = vst [vmem:[%s59_s1] sm:$0xff] %v12_v3  ;;  %17 = vst [vmem:[%s59_s1 + $0x8] sm:$0xff] %v13_v4 }
   0x5   :  { %18 = vst [vmem:[%s59_s1 + $0x10] sm:$0xff] %v14_v5  ;;  %19 = vst [vmem:[%s59_s1 + $0x18] sm:$0xff] %v15_v7 }

</bundles_post_ra>
